<compile_context>
chip_gen: v5e
topology: v5e:2x2
jax: 0.10.0
libtpu: 0.0.40
codegen_flags: <defaults>
</compile_context>

<pallas_src>
import functools

import jax
import jax.numpy as jnp
from jax.experimental import pallas as pl
from jax.experimental.pallas import tpu as pltpu


# ----------------------------------------------------------------------------- kernel
def unmask_select_kernel(token_ref, enc_ref, mask_ref, out_ref):
    # token_ref : (E, st)        batch-independent mask-token embedding (f32)
    # enc_ref   : (bt, E, st)    encoder features
    # mask_ref  : (bt, 1, st)    mask (>0 means "keep encoder feature")
    # out_ref   : (bt, E, st)
    res = jnp.where(mask_ref[...] > 0, enc_ref[...], token_ref[...][None])
    out_ref[...] = res.astype(out_ref.dtype)


# --------------------------------------------------------------------------- wrapper
def _mask_token(weight, bias, H, W, raw_value):
    """Batch-independent Conv2d(const image) computed once in the wrapper.

    Returns the (E, H*W) float32 token embedding.
    """
    E, C, ps, _ = weight.shape
    pad = ps // 2
    xp = jnp.pad(jnp.full((C, H, W), raw_value, dtype=jnp.float32),
                 ((0, 0), (pad, pad), (pad, pad)))
    # im2col of the constant padded image: (C*ps*ps, H*W), ordering matches
    # weight.reshape(E, C*ps*ps) (c major, then ki, then kj).
    cols = jnp.stack([xp[:, ki:ki + H, kj:kj + W].reshape(C, H * W)
                      for ki in range(ps) for kj in range(ps)], axis=1)
    cols = cols.reshape(C * ps * ps, H * W)
    wmat = weight.reshape(E, C * ps * ps).astype(jnp.float32)
    return wmat @ cols + bias.reshape(E, 1).astype(jnp.float32)


def _pick_spatial_tile(HW, E, itemsize, target_bytes):
    if E * HW * itemsize <= target_bytes or HW % 128 != 0:
        return HW                                   # full (lane-dense) spatial extent
    for d in range(HW // 128, 0, -1):               # largest 128-multiple divisor that fits
        st = d * 128
        if HW % st == 0 and E * st * itemsize <= target_bytes:
            return st
    return 128


def _pick_batch_tile(B, bytes_per_batch_block, target_bytes):
    bt = max(1, min(B, target_bytes // max(1, bytes_per_batch_block)))
    while B % bt != 0:                              # keep the grid exact
        bt -= 1
    return bt


def unmask_embed(enc_emb, mask, weight, bias, *, raw_value=127.0 / 255.0,
                 patch_size=3):
    B, E, H, W = enc_emb.shape
    assert patch_size % 2 == 1, "odd patch_size required so conv output matches H, W"
    HW = H * W

    out_dtype = jnp.result_type(enc_emb.dtype, jnp.float32)
    itemsize = jnp.dtype(out_dtype).itemsize
    target_bytes = 4 * 1024 * 1024                  # ~4 MiB per (bt, E, st) block

    st = _pick_spatial_tile(HW, E, itemsize, target_bytes)
    bt = _pick_batch_tile(B, E * st * itemsize, target_bytes)
    grid = (B // bt, HW // st)

    token = _mask_token(weight, bias, H, W, raw_value)          # (E, HW) f32, once
    enc_flat = enc_emb.reshape(B, E, HW)                        # free for NCHW layout
    mask_flat = mask.reshape(B, 1, HW)

    out = pl.pallas_call(
        unmask_select_kernel,
        out_shape=jax.ShapeDtypeStruct((B, E, HW), out_dtype),
        grid=grid,
        in_specs=[
            pl.BlockSpec((E, st), lambda b, s: (0, s)),         # token (batch-invariant)
            pl.BlockSpec((bt, E, st), lambda b, s: (b, 0, s)),  # enc_emb
            pl.BlockSpec((bt, 1, st), lambda b, s: (b, 0, s)),  # mask
        ],
        out_specs=pl.BlockSpec((bt, E, st), lambda b, s: (b, 0, s)),
        compiler_params=pltpu.CompilerParams(
            dimension_semantics=("parallel", "parallel")),      # safe: no scratch carry
    )(token, enc_flat, mask_flat)

    return out.reshape(B, E, H, W)


# ------------------------------------------------------------------------- reference
def unmask_embed_reference(enc_emb, mask, weight, bias, *,
                           raw_value=127.0 / 255.0, patch_size=3):
    """Pure-JAX reference matching the PyTorch forward."""
    B, E, H, W = enc_emb.shape
    C = weight.shape[1]
    pad = patch_size // 2
    raw = jnp.full((B, C, H, W), raw_value, dtype=jnp.float32)
    conv = jax.lax.conv_general_dilated(
        raw, weight.astype(jnp.float32), window_strides=(1, 1),
        padding=[(pad, pad), (pad, pad)],
        dimension_numbers=("NCHW", "OIHW", "NCHW"))
    conv = conv + bias.reshape(1, E, 1, 1)
    return jnp.where(mask > 0, enc_emb, conv)


if __name__ == "__main__":
    # Small deterministic config: embed_dim=32, in_chans=4, patch_size=3, B=2, H=W=16.
    B, E, C, H, W, ps = 2, 32, 4, 16, 16, 3

    key = jax.random.PRNGKey(0)
    k_w, k_b, k_enc, k_m = jax.random.split(key, 4)

    weight = jax.random.normal(k_w, (E, C, ps, ps), dtype=jnp.float32) * 0.05
    bias = jax.random.normal(k_b, (E,), dtype=jnp.float32) * 0.01
    enc_emb = jax.random.normal(k_enc, (B, E, H, W), dtype=jnp.float32)
    mask = (jax.random.uniform(k_m, (B, 1, H, W)) > 0.5).astype(jnp.float32)

    out = unmask_embed(enc_emb, mask, weight, bias, patch_size=ps)
    out = jax.block_until_ready(out)

    ref = unmask_embed_reference(enc_emb, mask, weight, bias, patch_size=ps)
    assert out.shape == (B, E, H, W)
    assert jnp.max(jnp.abs(out - ref)) < 1e-4, "mismatch vs reference"

    print("KERNEL_OK")
</pallas_src>

<mosaic_0001>
module attributes {stable_mosaic.version = 11 : i64} {
  func.func @unmask_select_kernel(%arg0: i32, %arg1: i32, %arg2: memref<32x256xf32, #tpu.memory_space<vmem>>, %arg3: memref<2x32x256xf32, #tpu.memory_space<vmem>>, %arg4: memref<2x1x256xf32, #tpu.memory_space<vmem>>, %arg5: memref<2x32x256xf32, #tpu.memory_space<vmem>>) attributes {dimension_semantics = [#tpu.dimension_semantics<parallel>, #tpu.dimension_semantics<parallel>], iteration_bounds = array<i64: 1, 1>, scalar_prefetch = 0 : i64, scratch_operands = 0 : i64, tpu.core_type = #tpu.core_type<tc>, window_params = [{transform_indices = @transform_0, window_bounds = array<i64: 32, 256>}, {transform_indices = @transform_1, window_bounds = array<i64: 2, 32, 256>}, {transform_indices = @transform_2, window_bounds = array<i64: 2, 1, 256>}, {transform_indices = @transform_3, window_bounds = array<i64: 2, 32, 256>}]} {
    %c0 = arith.constant 0 : index
    %c0_0 = arith.constant 0 : index
    %c0_1 = arith.constant 0 : index
    %0 = vector.load %arg4[%c0, %c0_0, %c0_1] : memref<2x1x256xf32, #tpu.memory_space<vmem>>, vector<2x1x256xf32>
    %cst = arith.constant 0.000000e+00 : f32
    %1 = vector.broadcast %cst : f32 to vector<2x1x256xf32>
    %2 = arith.cmpf ogt, %0, %1 : vector<2x1x256xf32>
    %c0_2 = arith.constant 0 : index
    %c0_3 = arith.constant 0 : index
    %c0_4 = arith.constant 0 : index
    %3 = vector.load %arg3[%c0_2, %c0_3, %c0_4] : memref<2x32x256xf32, #tpu.memory_space<vmem>>, vector<2x32x256xf32>
    %c0_5 = arith.constant 0 : index
    %c0_6 = arith.constant 0 : index
    %4 = vector.load %arg2[%c0_5, %c0_6] : memref<32x256xf32, #tpu.memory_space<vmem>>, vector<32x256xf32>
    %5 = vector.shape_cast %4 : vector<32x256xf32> to vector<1x32x256xf32>
    %6 = vector.shape_cast %2 : vector<2x1x256xi1> to vector<2x1x256xi1>
    %7 = vector.broadcast %6 : vector<2x1x256xi1> to vector<2x32x256xi1>
    %8 = vector.shape_cast %5 : vector<1x32x256xf32> to vector<1x32x256xf32>
    %9 = vector.broadcast %8 : vector<1x32x256xf32> to vector<2x32x256xf32>
    %10 = arith.select %7, %3, %9 : vector<2x32x256xi1>, vector<2x32x256xf32>
    %c0_7 = arith.constant 0 : index
    %c0_8 = arith.constant 0 : index
    %c0_9 = arith.constant 0 : index
    %11 = vector.load %arg5[%c0_7, %c0_8, %c0_9] : memref<2x32x256xf32, #tpu.memory_space<vmem>>, vector<2x32x256xf32>
    tpu.vector_store %arg5[%c0_7, %c0_8, %c0_9], %10 {strides = array<i32>} : memref<2x32x256xf32, #tpu.memory_space<vmem>>, vector<2x32x256xf32>,
    return
  }
  func.func @transform_0(%arg0: i32, %arg1: i32) -> (i32, i32) {
    %c0_i32 = arith.constant 0 : i32
    %c0_i32_0 = arith.constant 0 : i32
    return %c0_i32, %arg1 : i32, i32
  }
  func.func @transform_1(%arg0: i32, %arg1: i32) -> (i32, i32, i32) {
    %c0_i32 = arith.constant 0 : i32
    %c0_i32_0 = arith.constant 0 : i32
    return %arg0, %c0_i32, %arg1 : i32, i32, i32
  }
  func.func @transform_2(%arg0: i32, %arg1: i32) -> (i32, i32, i32) {
    %c0_i32 = arith.constant 0 : i32
    %c0_i32_0 = arith.constant 0 : i32
    return %arg0, %c0_i32, %arg1 : i32, i32, i32
  }
  func.func @transform_3(%arg0: i32, %arg1: i32) -> (i32, i32, i32) {
    %c0_i32 = arith.constant 0 : i32
    %c0_i32_0 = arith.constant 0 : i32
    return %arg0, %c0_i32, %arg1 : i32, i32, i32
  }
}

</mosaic_0001>

<bundles_post_ra>
// kernel: tpu_custom_call.1
= control target key start
LH: loop header
LB: loop body
LE: loop exit
PB: predicated region body
PF: predicated region fallthrough
CT: control target
= control target key end

     0   :  { %8 = vsyncpa [#allocation3], 0  ;;  %s361_s0 = inlined_call_operand.hbm [shape: f32[32,256], index: 0, kind: input, shape index: {}]   ;;  %s362_s1 = inlined_call_operand.hbm [shape: f32[2,32,256], index: 1, kind: input, shape index: {}]   ;;  %s363_s2 = inlined_call_operand.hbm [shape: f32[2,1,256], index: 2, kind: input, shape index: {}]   ;;  %s364_s3 = inlined_call_operand.hbm [shape: f32[2,32,256], index: 3, kind: output, shape index: {}]  }
   0x1   :  { %9 = vsyncpa [#allocation6], 0 }
   0x2   :  { %10 = vsyncpa [#allocation4], 0  ;;  %s28_s14 = sshll.u32 %s362_s1, 4  ;;  %s263_s15 = smov [#allocation5]   ;;  %s29_s14 = int_to_ptr.hbm [resolvable:$true] %s28_s14 }
   0x3   :  { %s30_s16 = sshll.u32 %s263_s15, 4  ;;  %s15_s19 = sshll.u32 %s361_s0, 4  ;;  %s31_s16 = int_to_ptr.vmem [resolvable:$true] %s30_s16  ;;  %s16_s19 = int_to_ptr.hbm [resolvable:$true] %s15_s19 }
   0x4   :  { %s264_s20 = smov 256   ;;  %s265_s21 = smov 16  }
   0x5   :  { %36 = dma.hbm_to_vmem [thread:$0]  %s29_s14, 2048, %s31_s16, [#allocation6], %s264_s20, %s264_s20, %s265_s21  }
   0x6   :  { %s266_s22 = smov [#allocation2]   ;;  %s41_s1 = sshll.u32 %s363_s2, 4  ;;  %s42_s1 = int_to_ptr.hbm [resolvable:$true] %s41_s1 }
   0x7   :  { %s17_s23 = sshll.u32 %s266_s22, 4  ;;  %s267_s0 = smov [#allocation7]   ;;  %s18_s23 = int_to_ptr.vmem [resolvable:$true] %s17_s23 }
   0x8   :  { %23 = dma.hbm_to_vmem [thread:$0]  %s16_s19, 1024, %s18_s23, [#allocation3], %s264_s20, %s264_s20, %s265_s21  }
   0x9   :  { %s43_s26 = sshll.u32 %s267_s0, 4  ;;  %s268_s27 = smov 32   ;;  %s44_s26 = int_to_ptr.vmem [resolvable:$true] %s43_s26 }
   0xa   :  { %s269_s28 = smov 2  }
   0xb   :  { %49 = dma.hbm_to_vmem [thread:$0]  %s42_s1, 64, %s44_s26, [#allocation6], %s268_s27, %s268_s27, %s269_s28  }
   0xc   :  { %257 = dma.done.wait [#allocation3], 1024  }
   0xd   :  { %258 = vsyncadd [#allocation3], 4294966272 }
   0xe   :  { %259 = dma.done.wait [#allocation6], 2112  }
   0xf   :  { %260 = vsyncadd [#allocation6], 4294965184  ;;  %v62_v0 = vld [vmem:[#allocation7] sm:$0x3]  ;;  %v270_v3 = vmov 0   ;;  %v67_v5 = vld [vmem:[#allocation5 + $0x8] sm:$0xff] }
  0x10   :  { %vm64_vm0 = vcmp.gt.f32.partialorder %v62_v0, 0.0  ;;  %v66_v1 = vld [vmem:[#allocation5] sm:$0xff]  ;;  %v83_v7 = vld [vmem:[#allocation2 + $0x8] sm:$0xff]  ;;  %v68_v9 = vld [vmem:[#allocation5 + $0x10] sm:$0xff]  ;;  %s271_s2 = smov [#allocation8]   ;;  %s138_s5 = sshll.u32 %s364_s3, 4  ;;  %s139_s5 = int_to_ptr.hbm [resolvable:$true] %s138_s5 }
  0x11   :  { %v82_v2 = vld [vmem:[#allocation2] sm:$0xff]  ;;  %v90_v4 = vsel %vm64_vm0, 1, %v270_v3  ;;  %v84_v10 = vld [vmem:[#allocation2 + $0x10] sm:$0xff]  ;;  %v69_v11 = vld [vmem:[#allocation5 + $0x18] sm:$0xff]  ;;  %s136_s29 = sshll.u32 %s271_s2, 4  ;;  %s137_s29 = int_to_ptr.vmem [resolvable:$true] %s136_s29 }
  0x12   :  { %v92_v6 = vperm.slane %v90_v4, 0  ;;  %v93_v8 = vperm.slane %v90_v4, 1  ;;  %v85_v12 = vld [vmem:[#allocation2 + $0x18] sm:$0xff]  ;;  %v70_v15 = vld [vmem:[#allocation5 + $0x20] sm:$0xff]  ;;  %v71_v21 = vld [vmem:[#allocation5 + $0x28] sm:$0xff] }
  0x13   :  { %v86_v16 = vld [vmem:[#allocation2 + $0x20] sm:$0xff]  ;;  %v87_v22 = vld [vmem:[#allocation2 + $0x28] sm:$0xff]  ;;  %v72_v24 = vld [vmem:[#allocation5 + $0x30] sm:$0xff] }
  0x14   :  { %vm307_vm1 = vcmp.eq.s32.totalorder %v92_v6, 1  ;;  %vm311_vm2 = vcmp.eq.s32.totalorder %v93_v8, 1  ;;  %v63_v17 = vld [vmem:[#allocation7 + $0x2] sm:$0x3]  ;;  %v88_v25 = vld [vmem:[#allocation2 + $0x30] sm:$0xff]  ;;  %v73_v27 = vld [vmem:[#allocation5 + $0x38] sm:$0xff] }
  0x15   :  { %v100_v18 = vsel %vm307_vm1, %v66_v1, %v82_v2  ;;  %v101_v19 = vsel %vm311_vm2, %v67_v5, %v83_v7  ;;  %v102_v20 = vsel %vm307_vm1, %v68_v9, %v84_v10  ;;  %v103_v23 = vsel %vm311_vm2, %v69_v11, %v85_v12  ;;  %v89_v28 = vld [vmem:[#allocation2 + $0x38] sm:$0xff]  ;;  %v74_v32 = vld [vmem:[#allocation5 + $0x40] sm:$0xff]  ;;  %v75_v34 = vld [vmem:[#allocation5 + $0x48] sm:$0xff] }
  0x16   :  { %116 = vst [vmem:[#allocation8] sm:$0xff] %v100_v18  ;;  %v104_v26 = vsel %vm307_vm1, %v70_v15, %v86_v16  ;;  %vm65_vm3 = vcmp.gt.f32.partialorder %v63_v17, 0.0  ;;  %v105_v29 = vsel %vm311_vm2, %v71_v21, %v87_v22  ;;  %v106_v31 = vsel %vm307_vm1, %v72_v24, %v88_v25  ;;  %v76_v37 = vld [vmem:[#allocation5 + $0x50] sm:$0xff]  ;;  %v77_v40 = vld [vmem:[#allocation5 + $0x58] sm:$0xff]  ;;  %v78_v43 = vld [vmem:[#allocation5 + $0x60] sm:$0xff] }
  0x17   :  { %117 = vst [vmem:[#allocation8 + $0x8] sm:$0xff] %v101_v19  ;;  %v91_v30 = vsel %vm65_vm3, 1, %v270_v3  ;;  %v107_v36 = vsel %vm311_vm2, %v73_v27, %v89_v28  ;;  %v79_v45 = vld [vmem:[#allocation5 + $0x68] sm:$0xff]  ;;  %v80_v47 = vld [vmem:[#allocation5 + $0x70] sm:$0xff]  ;;  %v81_v49 = vld [vmem:[#allocation5 + $0x78] sm:$0xff] }
  0x18   :  { %118 = vst [vmem:[#allocation8 + $0x10] sm:$0xff] %v102_v20  ;;  %v94_v33 = vperm.slane %v91_v30, 0  ;;  %v95_v35 = vperm.slane %v91_v30, 1 }
  0x19   :  { %119 = vst [vmem:[#allocation8 + $0x18] sm:$0xff] %v103_v23 }
  0x1a   :  { %120 = vst [vmem:[#allocation8 + $0x20] sm:$0xff] %v104_v26  ;;  %vm331_vm4 = vcmp.eq.s32.totalorder %v94_v33, 1  ;;  %vm335_vm5 = vcmp.eq.s32.totalorder %v95_v35, 1 }
  0x1b   :  { %121 = vst [vmem:[#allocation8 + $0x28] sm:$0xff] %v105_v29  ;;  %v108_v41 = vsel %vm331_vm4, %v74_v32, %v82_v2  ;;  %v109_v42 = vsel %vm335_vm5, %v75_v34, %v83_v7  ;;  %v110_v44 = vsel %vm331_vm4, %v76_v37, %v84_v10  ;;  %v111_v46 = vsel %vm335_vm5, %v77_v40, %v85_v12 }
  0x1c   :  { %122 = vst [vmem:[#allocation8 + $0x30] sm:$0xff] %v106_v31  ;;  %v112_v48 = vsel %vm331_vm4, %v78_v43, %v86_v16  ;;  %v113_v50 = vsel %vm335_vm5, %v79_v45, %v87_v22  ;;  %v114_v51 = vsel %vm331_vm4, %v80_v47, %v88_v25  ;;  %v115_v52 = vsel %vm335_vm5, %v81_v49, %v89_v28 }
  0x1d   :  { %123 = vst [vmem:[#allocation8 + $0x38] sm:$0xff] %v107_v36 }
  0x1e   :  { %124 = vst [vmem:[#allocation8 + $0x40] sm:$0xff] %v108_v41 }
  0x1f   :  { %125 = vst [vmem:[#allocation8 + $0x48] sm:$0xff] %v109_v42 }
  0x20   :  { %126 = vst [vmem:[#allocation8 + $0x50] sm:$0xff] %v110_v44 }
  0x21   :  { %127 = vst [vmem:[#allocation8 + $0x58] sm:$0xff] %v111_v46 }
  0x22   :  { %128 = vst [vmem:[#allocation8 + $0x60] sm:$0xff] %v112_v48 }
  0x23   :  { %129 = vst [vmem:[#allocation8 + $0x68] sm:$0xff] %v113_v50 }
  0x24   :  { %130 = vst [vmem:[#allocation8 + $0x70] sm:$0xff] %v114_v51 }
  0x25   :  { %131 = vst [vmem:[#allocation8 + $0x78] sm:$0xff] %v115_v52 }
  0x26   :  { %144 = dma.vmem_to_hbm [thread:$0]  %s137_s29, 2048, %s139_s5, [#allocation4], %s264_s20, %s264_s20, %s265_s21  }
  0x27   :  { %261 = dma.done.wait [#allocation4], 2048  }
  0x28   :  { %262 = vsyncadd [#allocation4], 4294965248 }
  0x29   :  { %149 = vsyncpa [#allocation3], 1 }
  0x2a   :  { %150 = vsyncpa [#allocation6], 1 }
  0x2b   :  { %151 = vsyncpa [#allocation4], 1 }

</bundles_post_ra>
